<compile_context>
chip_gen: v6e
topology: v6e:2x2x1
jax: 0.10.0
libtpu: 0.0.40
codegen_flags: <defaults>
</compile_context>

<pallas_src>
import functools
import math

import jax
import jax.numpy as jnp
from jax.experimental import pallas as pl
from jax.experimental.pallas import tpu as pltpu

_LANE = 128          # lane width: pad hidden feature dims to multiples of this
_SUBLANE = 8         # sublane width
_MAX_TILE_M = 1024   # batch-tile cap (amortizes ~0.35 us/step, feeds 256-row MXU)
_VMEM_LIMIT = 48 * 1024 * 1024   # <= 64 MiB/TC on v7x; plenty on v5e/v6e


def _round_up(x, m):
    return ((x + m - 1) // m) * m


def _use_transposed_head(out_dim):
    # Tiny output heads are computed transposed so the HBM writeback is
    # (out_dim, batch) instead of a (batch, 128)-padded slab + wrapper slice.
    return out_dim < _LANE


def _apply_activation(h, name):
    if name == "Sigmoid":
        return jax.nn.sigmoid(h)
    if name == "Tanh":
        return jnp.tanh(h)
    if name == "ReLU":
        return jnp.maximum(h, 0.0)
    if name in ("", None):
        return h
    if name == "Linear":
        # TODO(synk): output_activation == 'Linear' in the PyTorch module appends an
        # extra nn.Linear(hidden_size, output_size); not implemented here.
        raise NotImplementedError("output_activation='Linear' not supported")
    raise ValueError(name)


# ----------------------------------------------------------------------------
# Pallas kernel: fused MLP forward (all Linear layers + activations in one body)
# ----------------------------------------------------------------------------
def _mlp_kernel(x_ref, *refs, n_linear, hidden_activation, output_activation,
                transposed_head, out_dim):
    # refs = (w0, b0, w1, b1, ..., w_{L-1}, b_{L-1}, o_ref)
    o_ref = refs[-1]
    param_refs = refs[:-1]

    h = x_ref[...]                          # bf16 (tile_m, in_dim)
    for li in range(n_linear):
        w = param_refs[2 * li][...]         # bf16
        b = param_refs[2 * li + 1][...]     # f32
        last = li == n_linear - 1
        act = output_activation if last else hidden_activation
        if last and transposed_head:
            # w: (out_pad8, in_pad); h: (tile_m, in_pad).  Contract the feature
            # dim of both -> (out_pad8, tile_m): batch lands on the lane axis,
            # so the final store below is lane-dense.
            z = jax.lax.dot_general(
                w, h, (((1,), (1,)), ((), ())),
                preferred_element_type=jnp.float32,
            ) + b
        else:
            z = jnp.dot(h, w, preferred_element_type=jnp.float32) + b
        z = _apply_activation(z, act)       # f32 bias-add + activation
        if last:
            if transposed_head:
                # Drop the zero-weight sublane-padding rows before the store.
                o_ref[...] = z[:out_dim, :].astype(o_ref.dtype)
            else:
                o_ref[...] = z.astype(o_ref.dtype)
        else:
            h = z.astype(jnp.bfloat16)      # bf16 feed for the next MXU matmul


# ----------------------------------------------------------------------------
# Parameter construction (deterministic, mirrors NN.__init__ / init_weights)
# ----------------------------------------------------------------------------
def glorot_uniform(key, fan_in, fan_out):
    limit = math.sqrt(6.0 / (fan_in + fan_out))
    # PyTorch Linear weight layout is (out, in).
    return jax.random.uniform(key, (fan_out, fan_in), jnp.float32, -limit, limit)


def default_bias(key, fan_in, fan_out):
    bound = 1.0 / math.sqrt(fan_in)
    return jax.random.uniform(key, (fan_out,), jnp.float32, -bound, bound)


def build_params(params_cfg, key):
    sizes = ([params_cfg["input_size"]]
             + [params_cfg["hidden_size"]] * params_cfg["hidden_layers"]
             + [params_cfg["output_size"]])
    weights, biases = [], []
    for i in range(len(sizes) - 1):
        key, kw, kb = jax.random.split(key, 3)
        fan_in, fan_out = sizes[i], sizes[i + 1]
        weights.append(glorot_uniform(kw, fan_in, fan_out))  # (out, in), torch layout
        biases.append(default_bias(kb, fan_in, fan_out))     # (out,)
    return weights, biases


def prepare_kernel_params(weights, biases):
    """One-time layout plumbing (outside the per-call hot path).

    * weights -> bf16 (native MXU dtype); biases stay f32 (bias-add in f32).
    * hidden layers: transpose to (in, out), zero-pad `out` to 128 lanes (and
      the matching `in` of the next layer).  Zero padding is exact: padded
      hidden lanes only ever feed zero weight rows downstream.
    * tiny output head: keep torch (out, in) layout, zero-pad `out` to 8
      sublanes and `in` to the previous layer's padded width; the kernel
      computes it transposed and slices the padded rows off before storing.
    * the first layer's `in` dim stays at the native input width: padding x
      features would multiply x HBM traffic (do NOT "pad everything to 128").
    """
    n = len(weights)
    out_dim = weights[-1].shape[0]
    transposed_head = _use_transposed_head(out_dim)
    kw, kb = [], []
    prev_out_pad = weights[0].shape[1]  # first layer's in-dim stays unpadded
    for li, (w, b) in enumerate(zip(weights, biases)):
        o, i = w.shape
        in_pad = prev_out_pad
        last = li == n - 1
        if last and transposed_head:
            o_pad = _round_up(o, _SUBLANE)
            wt = (jnp.zeros((o_pad, in_pad), jnp.bfloat16)
                  .at[:o, :i].set(w.astype(jnp.bfloat16)))
            bp = jnp.zeros((o_pad, 1), jnp.float32).at[:o, 0].set(b)
            prev_out_pad = o_pad
        else:
            o_pad = _round_up(o, _LANE)
            wt = (jnp.zeros((in_pad, o_pad), jnp.bfloat16)
                  .at[:i, :o].set(w.T.astype(jnp.bfloat16)))
            bp = jnp.zeros((1, o_pad), jnp.float32).at[0, :o].set(b)
            prev_out_pad = o_pad
        kw.append(wt)
        kb.append(bp)
    return kw, kb


# ----------------------------------------------------------------------------
# Batch tiling
# ----------------------------------------------------------------------------
def _choose_tile_m(batch, transposed_head):
    # Transposed head puts batch on the output lane axis -> tiles of 128 when
    # the grid has more than one step; otherwise sublane (8) granularity.
    gran = _LANE if transposed_head else _SUBLANE
    if batch <= 2 * gran:
        return batch                      # single tile; block == full dims
    if batch <= _MAX_TILE_M:
        # >= 2 grid steps so both v7x TensorCores get work ("parallel" axis).
        return min(_MAX_TILE_M, _round_up(pl.cdiv(batch, 2), gran))
    return _MAX_TILE_M


# ----------------------------------------------------------------------------
# Forward pass: single pallas_call, batch-tiled grid
# ----------------------------------------------------------------------------
@functools.partial(
    jax.jit,
    static_argnames=("hidden_activation", "output_activation", "out_dim",
                     "single_buffer_weights"),
)
def nn_forward(x, kernel_weights, kernel_biases, *, hidden_activation,
               output_activation, out_dim, single_buffer_weights=True):
    batch, in_dim = x.shape
    n_linear = len(kernel_weights)
    transposed_head = _use_transposed_head(out_dim)

    x_lp = x.astype(jnp.bfloat16)   # native MXU dtype; halves x HBM/VMEM bytes
    tile_m = _choose_tile_m(batch, transposed_head)
    grid = (pl.cdiv(batch, tile_m),)

    def const_spec(shape):
        # Grid-invariant operand: VMEM-resident across all batch tiles and
        # single-buffered (double-buffering a constant just wastes VMEM).
        if single_buffer_weights:
            return pl.BlockSpec(shape, lambda m: (0, 0),
                                pipeline_mode=pl.Buffered(1))
        return pl.BlockSpec(shape, lambda m: (0, 0))

    inputs = [x_lp]
    in_specs = [pl.BlockSpec((tile_m, in_dim), lambda m: (m, 0))]
    for w, b in zip(kernel_weights, kernel_biases):
        inputs += [w, b]
        in_specs += [const_spec(w.shape), const_spec(b.shape)]

    if transposed_head:
        out_shape = jax.ShapeDtypeStruct((out_dim, batch), jnp.float32)
        out_spec = pl.BlockSpec((out_dim, tile_m), lambda m: (0, m))
    else:
        out_pad = kernel_weights[-1].shape[1]
        out_shape = jax.ShapeDtypeStruct((batch, out_pad), jnp.float32)
        out_spec = pl.BlockSpec((tile_m, out_pad), lambda m: (m, 0))

    # Advisory cost estimate for XLA scheduling around the custom call.
    flops = int(2 * batch * sum(w.shape[0] * w.shape[1] for w in kernel_weights))
    transcendentals = 0
    for li, w in enumerate(kernel_weights):
        act = output_activation if li == n_linear - 1 else hidden_activation
        if act in ("Sigmoid", "Tanh"):
            transcendentals += batch * (out_dim if li == n_linear - 1 else w.shape[-1])
    out_cols = out_dim if transposed_head else kernel_weights[-1].shape[1]
    bytes_accessed = int(
        2 * x_lp.size
        + sum(2 * w.size for w in kernel_weights)
        + sum(4 * b.size for b in kernel_biases)
        + 4 * batch * out_cols)

    kernel = functools.partial(
        _mlp_kernel,
        n_linear=n_linear,
        hidden_activation=hidden_activation,
        output_activation=output_activation,
        transposed_head=transposed_head,
        out_dim=out_dim,
    )

    y = pl.pallas_call(
        kernel,
        grid=grid,
        in_specs=in_specs,
        out_specs=out_spec,
        out_shape=out_shape,
        compiler_params=pltpu.CompilerParams(
            dimension_semantics=("parallel",),      # megacore split on v7x
            vmem_limit_bytes=_VMEM_LIMIT,
        ),
        cost_estimate=pl.CostEstimate(
            flops=flops,
            transcendentals=int(transcendentals),
            bytes_accessed=bytes_accessed,
        ),
    )(*inputs)

    if transposed_head:
        return y.T              # (batch, out_dim); trivial for out_dim == 1
    return y[:, :out_dim]       # drop zero-padded output lanes


# ----------------------------------------------------------------------------
# Pure-JAX reference (unpadded torch-layout params, highest-precision matmuls)
# ----------------------------------------------------------------------------
def nn_forward_ref(x, weights, biases, hidden_activation, output_activation):
    h = x
    n = len(weights)
    for i, (w, b) in enumerate(zip(weights, biases)):
        h = jnp.dot(h, w.T, precision=jax.lax.Precision.HIGHEST) + b
        h = _apply_activation(h, hidden_activation if i < n - 1 else output_activation)
    return h


if __name__ == "__main__":
    # Hyperparameter dict analogous to NN(params=...)
    params_cfg = {
        "input_size": 16,
        "hidden_size": 32,
        "hidden_layers": 2,      # -> 3 Linear layers total
        "output_size": 1,
        "hidden_activation": "ReLU",
        "output_activation": "Sigmoid",
        "weight_init": "glorot_uniform",
    }
    # TODO(synk): optimizer / fit() training loop / metrics / plots are host-side
    # logic, not part of the forward-pass kernel.

    key = jax.random.PRNGKey(0)
    key, kx = jax.random.split(key)
    batch = 8
    x = jax.random.normal(kx, (batch, params_cfg["input_size"]), jnp.float32)

    # Torch-layout f32 params (for the reference) + one-time kernel-layout params.
    weights, biases = build_params(params_cfg, key)
    kernel_weights, kernel_biases = prepare_kernel_params(weights, biases)

    fwd_kwargs = dict(
        hidden_activation=params_cfg["hidden_activation"],
        output_activation=params_cfg["output_activation"],
        out_dim=params_cfg["output_size"],
    )
    try:
        y = jax.block_until_ready(
            nn_forward(x, kernel_weights, kernel_biases,
                       single_buffer_weights=True, **fwd_kwargs))
    except Exception:
        # Fallback in case this jax build rejects pl.Buffered(1) on
        # grid-invariant operands; semantics are identical either way.
        y = jax.block_until_ready(
            nn_forward(x, kernel_weights, kernel_biases,
                       single_buffer_weights=False, **fwd_kwargs))

    y_ref = nn_forward_ref(
        x, weights, biases,
        params_cfg["hidden_activation"], params_cfg["output_activation"],
    )
    assert y.shape == (batch, params_cfg["output_size"]), y.shape
    # bf16 MXU inputs with f32 accumulation vs. an all-f32 HIGHEST reference.
    assert jnp.allclose(y, y_ref, atol=2e-2, rtol=2e-2), "mismatch vs reference"

    print("KERNEL_OK")
</pallas_src>

<mosaic_0001>
module attributes {stable_mosaic.version = 11 : i64} {
  func.func @_mlp_kernel(%arg0: i32, %arg1: memref<8x16xbf16, #tpu.memory_space<vmem>>, %arg2: memref<16x128xbf16, #tpu.memory_space<vmem>>, %arg3: memref<1x128xf32, #tpu.memory_space<vmem>>, %arg4: memref<128x128xbf16, #tpu.memory_space<vmem>>, %arg5: memref<1x128xf32, #tpu.memory_space<vmem>>, %arg6: memref<8x128xbf16, #tpu.memory_space<vmem>>, %arg7: memref<8x1xf32, #tpu.memory_space<vmem>>, %arg8: memref<1x8xf32, #tpu.memory_space<vmem>>) attributes {dimension_semantics = [#tpu.dimension_semantics<parallel>], iteration_bounds = array<i64: 1>, scalar_prefetch = 0 : i64, scratch_operands = 0 : i64, tpu.core_type = #tpu.core_type<tc>, window_params = [{transform_indices = @transform_0, window_bounds = array<i64: 8, 16>}, {pipeline_mode = #tpu.pipeline_mode<synchronous>, transform_indices = @transform_1, window_bounds = array<i64: 16, 128>}, {pipeline_mode = #tpu.pipeline_mode<synchronous>, transform_indices = @transform_2, window_bounds = array<i64: 1, 128>}, {pipeline_mode = #tpu.pipeline_mode<synchronous>, transform_indices = @transform_3, window_bounds = array<i64: 128, 128>}, {pipeline_mode = #tpu.pipeline_mode<synchronous>, transform_indices = @transform_4, window_bounds = array<i64: 1, 128>}, {pipeline_mode = #tpu.pipeline_mode<synchronous>, transform_indices = @transform_5, window_bounds = array<i64: 8, 128>}, {pipeline_mode = #tpu.pipeline_mode<synchronous>, transform_indices = @transform_6, window_bounds = array<i64: 8, 1>}, {transform_indices = @transform_7, window_bounds = array<i64: 1, 8>}]} {
    %c0 = arith.constant 0 : index
    %c0_0 = arith.constant 0 : index
    %0 = vector.load %arg1[%c0, %c0_0] : memref<8x16xbf16, #tpu.memory_space<vmem>>, vector<8x16xbf16>
    %c0_1 = arith.constant 0 : index
    %c0_2 = arith.constant 0 : index
    %1 = vector.load %arg2[%c0_1, %c0_2] : memref<16x128xbf16, #tpu.memory_space<vmem>>, vector<16x128xbf16>
    %c0_3 = arith.constant 0 : index
    %c0_4 = arith.constant 0 : index
    %2 = vector.load %arg3[%c0_3, %c0_4] : memref<1x128xf32, #tpu.memory_space<vmem>>, vector<1x128xf32>
    %cst = arith.constant dense<0.000000e+00> : vector<8x128xf32>
    %3 = tpu.matmul %0, %1, %cst {dimension_numbers = #tpu.dot_dimension_numbers<[1], [0], [0], [1], [0, 0, 1, 1], [], []>} : vector<8x16xbf16>, vector<16x128xbf16>, vector<8x128xf32> -> vector<8x128xf32>
    %4 = vector.broadcast %2 : vector<1x128xf32> to vector<8x128xf32>
    %5 = arith.addf %3, %4 : vector<8x128xf32>
    %cst_5 = arith.constant 0.000000e+00 : f32
    %6 = vector.broadcast %cst_5 : f32 to vector<8x128xf32>
    %7 = arith.maximumf %5, %6 : vector<8x128xf32>
    %8 = arith.truncf %7 : vector<8x128xf32> to vector<8x128xbf16>
    %c0_6 = arith.constant 0 : index
    %c0_7 = arith.constant 0 : index
    %9 = vector.load %arg4[%c0_6, %c0_7] : memref<128x128xbf16, #tpu.memory_space<vmem>>, vector<128x128xbf16>
    %c0_8 = arith.constant 0 : index
    %c0_9 = arith.constant 0 : index
    %10 = vector.load %arg5[%c0_8, %c0_9] : memref<1x128xf32, #tpu.memory_space<vmem>>, vector<1x128xf32>
    %cst_10 = arith.constant dense<0.000000e+00> : vector<8x128xf32>
    %11 = tpu.matmul %8, %9, %cst_10 {dimension_numbers = #tpu.dot_dimension_numbers<[1], [0], [0], [1], [0, 0, 1, 1], [], []>} : vector<8x128xbf16>, vector<128x128xbf16>, vector<8x128xf32> -> vector<8x128xf32>
    %12 = vector.broadcast %10 : vector<1x128xf32> to vector<8x128xf32>
    %13 = arith.addf %11, %12 : vector<8x128xf32>
    %cst_11 = arith.constant 0.000000e+00 : f32
    %14 = vector.broadcast %cst_11 : f32 to vector<8x128xf32>
    %15 = arith.maximumf %13, %14 : vector<8x128xf32>
    %16 = arith.truncf %15 : vector<8x128xf32> to vector<8x128xbf16>
    %c0_12 = arith.constant 0 : index
    %c0_13 = arith.constant 0 : index
    %17 = vector.load %arg6[%c0_12, %c0_13] : memref<8x128xbf16, #tpu.memory_space<vmem>>, vector<8x128xbf16>
    %c0_14 = arith.constant 0 : index
    %c0_15 = arith.constant 0 : index
    %18 = vector.load %arg7[%c0_14, %c0_15] : memref<8x1xf32, #tpu.memory_space<vmem>>, vector<8x1xf32>
    %cst_16 = arith.constant dense<0.000000e+00> : vector<8x8xf32>
    %19 = tpu.matmul %17, %16, %cst_16 {dimension_numbers = #tpu.dot_dimension_numbers<[1], [1], [0], [0], [0, 0, 1, 0], [], []>} : vector<8x128xbf16>, vector<8x128xbf16>, vector<8x8xf32> -> vector<8x8xf32>
    %20 = vector.broadcast %18 : vector<8x1xf32> to vector<8x8xf32>
    %21 = arith.addf %19, %20 : vector<8x8xf32>
    %22 = arith.negf %21 : vector<8x8xf32>
    %23 = math.exp %22 : vector<8x8xf32>
    %cst_17 = arith.constant 1.000000e+00 : f32
    %24 = vector.broadcast %cst_17 : f32 to vector<8x8xf32>
    %25 = arith.addf %24, %23 : vector<8x8xf32>
    %26 = arith.divf %24, %25 : vector<8x8xf32>
    %27 = vector.extract_strided_slice %26 {offsets = [0, 0], sizes = [1, 8], strides = [1, 1]} : vector<8x8xf32> to vector<1x8xf32>
    %c0_18 = arith.constant 0 : index
    %c0_19 = arith.constant 0 : index
    %28 = vector.load %arg8[%c0_18, %c0_19] : memref<1x8xf32, #tpu.memory_space<vmem>>, vector<1x8xf32>
    tpu.vector_store %arg8[%c0_18, %c0_19], %27 {strides = array<i32>} : memref<1x8xf32, #tpu.memory_space<vmem>>, vector<1x8xf32>,
    return
  }
  func.func @transform_0(%arg0: i32) -> (i32, i32) {
    %c0_i32 = arith.constant 0 : i32
    %c0_i32_0 = arith.constant 0 : i32
    return %arg0, %c0_i32 : i32, i32
  }
  func.func @transform_1(%arg0: i32) -> (i32, i32) {
    %c0_i32 = arith.constant 0 : i32
    %c0_i32_0 = arith.constant 0 : i32
    %c0_i32_1 = arith.constant 0 : i32
    return %c0_i32, %c0_i32_0 : i32, i32
  }
  func.func @transform_2(%arg0: i32) -> (i32, i32) {
    %c0_i32 = arith.constant 0 : i32
    %c0_i32_0 = arith.constant 0 : i32
    %c0_i32_1 = arith.constant 0 : i32
    return %c0_i32, %c0_i32_0 : i32, i32
  }
  func.func @transform_3(%arg0: i32) -> (i32, i32) {
    %c0_i32 = arith.constant 0 : i32
    %c0_i32_0 = arith.constant 0 : i32
    %c0_i32_1 = arith.constant 0 : i32
    return %c0_i32, %c0_i32_0 : i32, i32
  }
  func.func @transform_4(%arg0: i32) -> (i32, i32) {
    %c0_i32 = arith.constant 0 : i32
    %c0_i32_0 = arith.constant 0 : i32
    %c0_i32_1 = arith.constant 0 : i32
    return %c0_i32, %c0_i32_0 : i32, i32
  }
  func.func @transform_5(%arg0: i32) -> (i32, i32) {
    %c0_i32 = arith.constant 0 : i32
    %c0_i32_0 = arith.constant 0 : i32
    %c0_i32_1 = arith.constant 0 : i32
    return %c0_i32, %c0_i32_0 : i32, i32
  }
  func.func @transform_6(%arg0: i32) -> (i32, i32) {
    %c0_i32 = arith.constant 0 : i32
    %c0_i32_0 = arith.constant 0 : i32
    %c0_i32_1 = arith.constant 0 : i32
    return %c0_i32, %c0_i32_0 : i32, i32
  }
  func.func @transform_7(%arg0: i32) -> (i32, i32) {
    %c0_i32 = arith.constant 0 : i32
    %c0_i32_0 = arith.constant 0 : i32
    return %c0_i32, %arg0 : i32, i32
  }
}

module attributes {stable_mosaic.version = 11 : i64} {
  func.func @_mlp_kernel(%arg0: i32, %arg1: memref<8x16xbf16, #tpu.memory_space<vmem>>, %arg2: memref<16x128xbf16, #tpu.memory_space<vmem>>, %arg3: memref<1x128xf32, #tpu.memory_space<vmem>>, %arg4: memref<128x128xbf16, #tpu.memory_space<vmem>>, %arg5: memref<1x128xf32, #tpu.memory_space<vmem>>, %arg6: memref<8x128xbf16, #tpu.memory_space<vmem>>, %arg7: memref<8x1xf32, #tpu.memory_space<vmem>>, %arg8: memref<1x8xf32, #tpu.memory_space<vmem>>) attributes {dimension_semantics = [#tpu.dimension_semantics<parallel>], iteration_bounds = array<i64: 1>, scalar_prefetch = 0 : i64, scratch_operands = 0 : i64, tpu.core_type = #tpu.core_type<tc>, window_params = [{transform_indices = @transform_0, window_bounds = array<i64: 8, 16>}, {pipeline_mode = #tpu.pipeline_mode<synchronous>, transform_indices = @transform_1, window_bounds = array<i64: 16, 128>}, {pipeline_mode = #tpu.pipeline_mode<synchronous>, transform_indices = @transform_2, window_bounds = array<i64: 1, 128>}, {pipeline_mode = #tpu.pipeline_mode<synchronous>, transform_indices = @transform_3, window_bounds = array<i64: 128, 128>}, {pipeline_mode = #tpu.pipeline_mode<synchronous>, transform_indices = @transform_4, window_bounds = array<i64: 1, 128>}, {pipeline_mode = #tpu.pipeline_mode<synchronous>, transform_indices = @transform_5, window_bounds = array<i64: 8, 128>}, {pipeline_mode = #tpu.pipeline_mode<synchronous>, transform_indices = @transform_6, window_bounds = array<i64: 8, 1>}, {transform_indices = @transform_7, window_bounds = array<i64: 1, 8>}]} {
    %c0 = arith.constant 0 : index
    %c0_0 = arith.constant 0 : index
    %0 = vector.load %arg1[%c0, %c0_0] : memref<8x16xbf16, #tpu.memory_space<vmem>>, vector<8x16xbf16>
    %c0_1 = arith.constant 0 : index
    %c0_2 = arith.constant 0 : index
    %1 = vector.load %arg2[%c0_1, %c0_2] : memref<16x128xbf16, #tpu.memory_space<vmem>>, vector<16x128xbf16>
    %c0_3 = arith.constant 0 : index
    %c0_4 = arith.constant 0 : index
    %2 = vector.load %arg3[%c0_3, %c0_4] : memref<1x128xf32, #tpu.memory_space<vmem>>, vector<1x128xf32>
    %cst = arith.constant dense<0.000000e+00> : vector<8x128xf32>
    %3 = tpu.matmul %0, %1, %cst {dimension_numbers = #tpu.dot_dimension_numbers<[1], [0], [0], [1], [0, 0, 1, 1], [], []>} : vector<8x16xbf16>, vector<16x128xbf16>, vector<8x128xf32> -> vector<8x128xf32>
    %4 = vector.broadcast %2 : vector<1x128xf32> to vector<8x128xf32>
    %5 = arith.addf %3, %4 : vector<8x128xf32>
    %cst_5 = arith.constant 0.000000e+00 : f32
    %6 = vector.broadcast %cst_5 : f32 to vector<8x128xf32>
    %7 = arith.maximumf %5, %6 : vector<8x128xf32>
    %8 = arith.truncf %7 : vector<8x128xf32> to vector<8x128xbf16>
    %c0_6 = arith.constant 0 : index
    %c0_7 = arith.constant 0 : index
    %9 = vector.load %arg4[%c0_6, %c0_7] : memref<128x128xbf16, #tpu.memory_space<vmem>>, vector<128x128xbf16>
    %c0_8 = arith.constant 0 : index
    %c0_9 = arith.constant 0 : index
    %10 = vector.load %arg5[%c0_8, %c0_9] : memref<1x128xf32, #tpu.memory_space<vmem>>, vector<1x128xf32>
    %cst_10 = arith.constant dense<0.000000e+00> : vector<8x128xf32>
    %11 = tpu.matmul %8, %9, %cst_10 {dimension_numbers = #tpu.dot_dimension_numbers<[1], [0], [0], [1], [0, 0, 1, 1], [], []>} : vector<8x128xbf16>, vector<128x128xbf16>, vector<8x128xf32> -> vector<8x128xf32>
    %12 = vector.broadcast %10 : vector<1x128xf32> to vector<8x128xf32>
    %13 = arith.addf %11, %12 : vector<8x128xf32>
    %cst_11 = arith.constant 0.000000e+00 : f32
    %14 = vector.broadcast %cst_11 : f32 to vector<8x128xf32>
    %15 = arith.maximumf %13, %14 : vector<8x128xf32>
    %16 = arith.truncf %15 : vector<8x128xf32> to vector<8x128xbf16>
    %c0_12 = arith.constant 0 : index
    %c0_13 = arith.constant 0 : index
    %17 = vector.load %arg6[%c0_12, %c0_13] : memref<8x128xbf16, #tpu.memory_space<vmem>>, vector<8x128xbf16>
    %c0_14 = arith.constant 0 : index
    %c0_15 = arith.constant 0 : index
    %18 = vector.load %arg7[%c0_14, %c0_15] : memref<8x1xf32, #tpu.memory_space<vmem>>, vector<8x1xf32>
    %cst_16 = arith.constant dense<0.000000e+00> : vector<8x8xf32>
    %19 = tpu.matmul %17, %16, %cst_16 {dimension_numbers = #tpu.dot_dimension_numbers<[1], [1], [0], [0], [0, 0, 1, 0], [], []>} : vector<8x128xbf16>, vector<8x128xbf16>, vector<8x8xf32> -> vector<8x8xf32>
    %20 = vector.broadcast %18 : vector<8x1xf32> to vector<8x8xf32>
    %21 = arith.addf %19, %20 : vector<8x8xf32>
    %22 = arith.negf %21 : vector<8x8xf32>
    %23 = math.exp %22 : vector<8x8xf32>
    %cst_17 = arith.constant 1.000000e+00 : f32
    %24 = vector.broadcast %cst_17 : f32 to vector<8x8xf32>
    %25 = arith.addf %24, %23 : vector<8x8xf32>
    %26 = arith.divf %24, %25 : vector<8x8xf32>
    %27 = vector.extract_strided_slice %26 {offsets = [0, 0], sizes = [1, 8], strides = [1, 1]} : vector<8x8xf32> to vector<1x8xf32>
    %c0_18 = arith.constant 0 : index
    %c0_19 = arith.constant 0 : index
    %28 = vector.load %arg8[%c0_18, %c0_19] : memref<1x8xf32, #tpu.memory_space<vmem>>, vector<1x8xf32>
    tpu.vector_store %arg8[%c0_18, %c0_19], %27 {strides = array<i32>} : memref<1x8xf32, #tpu.memory_space<vmem>>, vector<1x8xf32>,
    return
  }
  func.func @transform_0(%arg0: i32) -> (i32, i32) {
    %c0_i32 = arith.constant 0 : i32
    %c0_i32_0 = arith.constant 0 : i32
    return %arg0, %c0_i32 : i32, i32
  }
  func.func @transform_1(%arg0: i32) -> (i32, i32) {
    %c0_i32 = arith.constant 0 : i32
    %c0_i32_0 = arith.constant 0 : i32
    %c0_i32_1 = arith.constant 0 : i32
    return %c0_i32, %c0_i32_0 : i32, i32
  }
  func.func @transform_2(%arg0: i32) -> (i32, i32) {
    %c0_i32 = arith.constant 0 : i32
    %c0_i32_0 = arith.constant 0 : i32
    %c0_i32_1 = arith.constant 0 : i32
    return %c0_i32, %c0_i32_0 : i32, i32
  }
  func.func @transform_3(%arg0: i32) -> (i32, i32) {
    %c0_i32 = arith.constant 0 : i32
    %c0_i32_0 = arith.constant 0 : i32
    %c0_i32_1 = arith.constant 0 : i32
    return %c0_i32, %c0_i32_0 : i32, i32
  }
  func.func @transform_4(%arg0: i32) -> (i32, i32) {
    %c0_i32 = arith.constant 0 : i32
    %c0_i32_0 = arith.constant 0 : i32
    %c0_i32_1 = arith.constant 0 : i32
    return %c0_i32, %c0_i32_0 : i32, i32
  }
  func.func @transform_5(%arg0: i32) -> (i32, i32) {
    %c0_i32 = arith.constant 0 : i32
    %c0_i32_0 = arith.constant 0 : i32
    %c0_i32_1 = arith.constant 0 : i32
    return %c0_i32, %c0_i32_0 : i32, i32
  }
  func.func @transform_6(%arg0: i32) -> (i32, i32) {
    %c0_i32 = arith.constant 0 : i32
    %c0_i32_0 = arith.constant 0 : i32
    %c0_i32_1 = arith.constant 0 : i32
    return %c0_i32, %c0_i32_0 : i32, i32
  }
  func.func @transform_7(%arg0: i32) -> (i32, i32) {
    %c0_i32 = arith.constant 0 : i32
    %c0_i32_0 = arith.constant 0 : i32
    return %c0_i32, %arg0 : i32, i32
  }
}

</mosaic_0001>

<bundles_post_ra>
// kernel: nn_forward.1
= control target key start
LH: loop header
LB: loop body
LE: loop exit
PB: predicated region body
PF: predicated region fallthrough
CT: control target
= control target key end

     0   :  { %12 = vsyncpa [#allocation3], 0  ;;  %s481_s0 = inlined_call_operand.vmem [shape: bf16[8,16], index: 0, kind: input, shape index: {}]   ;;  %s482_s1 = inlined_call_operand.vmem [shape: bf16[16,128], index: 1, kind: input, shape index: {}]   ;;  %s483_s2 = inlined_call_operand.vmem [shape: f32[1,128], index: 2, kind: input, shape index: {}]   ;;  %s484_s3 = inlined_call_operand.hbm [shape: bf16[128,128], index: 3, kind: input, shape index: {}]   ;;  %s485_s4 = inlined_call_operand.vmem [shape: f32[1,128], index: 4, kind: input, shape index: {}]   ;;  %s486_s5 = inlined_call_operand.vmem [shape: bf16[8,128], index: 5, kind: input, shape index: {}]   ;;  %s487_s6 = inlined_call_operand.vmem [shape: f32[8,1], index: 6, kind: input, shape index: {}]   ;;  %s488_s7 = inlined_call_operand.hbm [shape: f32[1,8], index: 7, kind: output, shape index: {}]  }
   0x1   :  { %13 = vsyncpa [#allocation4], 0  ;;  %s410_s24 = smov [#allocation2]  }
   0x2   :  { %s25_s25 = sshll.u32 %s410_s24, 4  ;;  %s26_s25 = int_to_ptr.vmem [resolvable:$true] %s25_s25 }
   0x3   :  { %s374_s26 = scalar_lea.vmem %s26_s25, 1024  ;;  %p379_p1 = scmp.lt.s32.totalorder %s26_s25, %s26_s25 }
   0x4   :  { %p375_p0 = scmp.ne.s32.totalorder %s26_s25, %s374_s26  ;;  %p380_p2 = scmp.lt.s32.totalorder %s374_s26, %s374_s26 }
   0x6   :  { %p381_p3 = por %p380_p2, %p379_p1 }
   0x8   :  { %p382_p4 = pnand %p381_p3, %p375_p0 }
   0xa   :  { %385 = shalt.err (!%p382_p4)
}
   0xb   :  { %s411_s27 = smov 64   ;;  %s412_s28 = smov 4  }
   0xc   :  { %31 = dma.hbm_to_vmem [thread:$0]  %s484_s3, 1024, %s26_s25, [#allocation3], %s411_s27, %s411_s27, %s412_s28  }
   0xd   :  { %406 = dma.done.wait [#allocation3], 1024  }
   0xe   :  { %407 = vsyncadd [#allocation3], 4294966272  ;;  %v413_v0 = vmov 0.0   ;;  %vm414_vm0 = vmmov 0   ;;  %v353_v1 = vld [vmem:[%s482_s1] sm:$0xff]   ;;  %vm58_vm1 = vcmask 130048  }
   0xf   :  { %313 = vmatprep.subr.bf16.mxu0 %v413_v0  ;;  %315 = vmatprep.mubr.msk.bf16.mxu0 %vm414_vm0, %v413_v0  ;;  %v42_v2 = vld [vmem:[%s481_s0] sm:$0xf]  ;;  %v354_v3 = vld [vmem:[#allocation2 + $0x38] sm:$0xff]   ;;  %v355_v4 = vld [vmem:[#allocation2 + $0x30] sm:$0xff]   ;;  %v415_v20 = vmov 0   ;;  %vm270_vm2 = vcmask 57344  }
  0x10   :  { %319 = vmatprep.subr.bf16.mxu1 %v413_v0  ;;  %335 = vmatprep.mubr.msk.bf16.mxu1 %vm414_vm0, %v413_v0  ;;  %v356_v5 = vld [vmem:[#allocation2 + $0x28] sm:$0xff]   ;;  %v357_v6 = vld [vmem:[#allocation2 + $0x20] sm:$0xff]   ;;  %v358_v7 = vld [vmem:[#allocation2 + $0x18] sm:$0xff]  }
  0x11   :  { %314 = vmatpush3.bf16.msra.mxu0 %v353_v1  ;;  %320 = vmatpush3.bf16.msra.mxu1 %v354_v3  ;;  %v359_v8 = vld [vmem:[#allocation2 + $0x10] sm:$0xff]   ;;  %v360_v9 = vld [vmem:[#allocation2 + $0x8] sm:$0xff]   ;;  %v361_v10 = vld [vmem:[#allocation2] sm:$0xff]  }
  0x12   :  { %339 = vmatprep.subr.bf16.mxu0 %v413_v0  ;;  %321 = vmatprep.subr.bf16.mxu1 %v413_v0  ;;  %v287_v11 = vld [vmem:[%s483_s2] ss:$0 sm:$0xff] }
  0x13   :  { %v218_v19 = vld [vmem:[%s487_s6] sm:$0xff]  ;;  %352 = vset.pattern.permute.xlu0 %v415_v20 }
  0x14   :  { %316 = vmatmul.mubr.msk.bf16.vlgmr.msra.gmra.mxu0 %vm58_vm1, %v42_v2  ;;  %221 = vperm.xlu0 %352, %v218_v19   ;;  %v290_v21 = vld [vmem:[%s485_s4] ss:$0 sm:$0xff]  ;;  %s416_s4 = smov [#allocation5]  }
  0x15   :  { %341 = vmatprep.mubr.msk.bf16.mxu0 %vm414_vm0, %v413_v0  ;;  %322 = vmatpush3.bf16.msra.mxu1 %v355_v4  ;;  %v217_v29 = vld [vmem:[%s486_s5] sm:$0xf]  ;;  %s278_s6 = sshll.u32 %s416_s4, 4  ;;  %s279_s6 = int_to_ptr.vmem [resolvable:$true] %s278_s6 }
  0x16   :  { %323 = vmatprep.subr.bf16.mxu1 %v413_v0  ;;  %s386_s16 = scalar_lea.vmem %s279_s6, 16  ;;  %s390_s5 = scalar_lea.vmem %s279_s6, 32 }
  0x17   :  { %p387_p5 = scmp.ne.s32.totalorder %s279_s6, %s386_s16  ;;  %p391_p6 = scmp.lt.s32.totalorder %s279_s6, %s279_s6 }
  0x18   :  { %p392_p7 = scmp.lt.s32.totalorder %s390_s5, %s386_s16 }
  0x19   :  { %324 = vmatpush3.bf16.msra.mxu1 %v356_v5 }
  0x1a   :  { %325 = vmatprep.subr.bf16.mxu1 %v413_v0  ;;  %p393_p8 = por %p392_p7, %p391_p6 }
  0x1c   :  { %p394_p9 = pnand %p393_p8, %p387_p5 }
  0x1d   :  { %326 = vmatpush3.bf16.msra.mxu1 %v357_v6 }
  0x1e   :  { %327 = vmatprep.subr.bf16.mxu1 %v413_v0 }
  0x21   :  { %328 = vmatpush3.bf16.msra.mxu1 %v358_v7 }
  0x22   :  { %329 = vmatprep.subr.bf16.mxu1 %v413_v0 }
  0x25   :  { %330 = vmatpush3.bf16.msra.mxu1 %v359_v8 }
  0x26   :  { %331 = vmatprep.subr.bf16.mxu1 %v413_v0 }
  0x29   :  { %332 = vmatpush3.bf16.msra.mxu1 %v360_v9 }
  0x2a   :  { %333 = vmatprep.subr.bf16.mxu1 %v413_v0 }
  0x2d   :  { %334 = vmatpush3.bf16.msra.mxu1 %v361_v10 }
  0x8f   :  { %v222_v30 = vpop.permute.xlu0 %221 }
  0xd4   :  { %v96_v12 = vpop.f32.mrf.mxu0 }
  0xd5   :  { %v97_v13 = vadd.f32 %v287_v11, %v96_v12 }
  0xd6   :  { %v317_v14 = vpop.f32.mrf.mxu0 }
  0xd7   :  { %v102_v15 = vmax.f32 %v97_v13, 0.0 }
  0xd8   :  { %v99_v16 = vpop.f32.mrf.mxu0 }
  0xd9   :  { %v103_v17 = vpack.c.bf16 %v102_v15, %v102_v15 }
  0xda   :  { %v318_v18 = vpop.f32.mrf.mxu0 }
  0xdb   :  { %336 = vmatmul.mubr.bf16.vlgmr.msra.gmra.mxu1 %v103_v17 }
 0x19b   :  { %v209_v22 = vpop.f32.mrf.mxu1 }
 0x19c   :  { %v210_v23 = vadd.f32 %v290_v21, %v209_v22 }
 0x19d   :  { %v337_v24 = vpop.f32.mrf.mxu1 }
 0x19e   :  { %v215_v25 = vmax.f32 %v210_v23, 0.0 }
 0x19f   :  { %v212_v26 = vpop.f32.mrf.mxu1 }
 0x1a0   :  { %v216_v27 = vpack.c.bf16 %v215_v25, %v215_v25 }
 0x1a1   :  { %v338_v28 = vpop.f32.mrf.mxu1 }
 0x1a2   :  { %340 = vmatpush3.bf16.xpose.msra.mxu0 %v216_v27 }
 0x1a9   :  { %342 = vmatmul.mubr.bf16.vlgmr.msra.gmra.mxu0 %v217_v29 }
 0x269   :  { %v258_v31 = vpop.f32.mrf.mxu0 }
 0x26a   :  { %v259_v32 = vadd.f32 %v258_v31, %v222_v30 }
 0x26b   :  { %v343_v33 = vpop.f32.mrf.mxu0 }
 0x26c   :  { %v299_v34 = vmul.f32 -1.442695, %v259_v32 }
 0x26d   :  { %v261_v35 = vpop.f32.mrf.mxu0 }
 0x26e   :  { %362 = vpow2.f32 %v299_v34 }
 0x26f   :  { %v344_v36 = vpop.f32.mrf.mxu0 }
 0x27b   :  { %v363_v37 = vpop.eup %362 }
 0x27c   :  { %v267_v38 = vadd.f32 1.0, %v363_v37 }
 0x27e   :  { %364 = vrcp.f32 %v267_v38 }
 0x28b   :  { %v365_v39 = vpop.eup %364 }
 0x28c   :  { %271 = vst.msk [vmem:[#allocation5] sm:$0x1] %vm270_vm2, %v365_v39 }
 0x28d   :  { %397 = shalt.err (!%p394_p9)
}
 0x28e   :  { %281 = dma.vmem_to_hbm [thread:$0]  %s279_s6, 16, %s488_s7, [#allocation4]  }
 0x28f   :  { %408 = dma.done.wait [#allocation4], 16  }
 0x290   :  { %409 = vsyncadd [#allocation4], 4294967280 }
 0x291   :  { %285 = vsyncpa [#allocation3], 1 }
 0x292   :  { %286 = vsyncpa [#allocation4], 1 }

// kernel: nn_forward.1
= control target key start
LH: loop header
LB: loop body
LE: loop exit
PB: predicated region body
PF: predicated region fallthrough
CT: control target
= control target key end

     0   :  { %12 = vsyncpa [#allocation3], 0  ;;  %s481_s0 = inlined_call_operand.vmem [shape: bf16[8,16], index: 0, kind: input, shape index: {}]   ;;  %s482_s1 = inlined_call_operand.vmem [shape: bf16[16,128], index: 1, kind: input, shape index: {}]   ;;  %s483_s2 = inlined_call_operand.vmem [shape: f32[1,128], index: 2, kind: input, shape index: {}]   ;;  %s484_s3 = inlined_call_operand.hbm [shape: bf16[128,128], index: 3, kind: input, shape index: {}]   ;;  %s485_s4 = inlined_call_operand.vmem [shape: f32[1,128], index: 4, kind: input, shape index: {}]   ;;  %s486_s5 = inlined_call_operand.vmem [shape: bf16[8,128], index: 5, kind: input, shape index: {}]   ;;  %s487_s6 = inlined_call_operand.vmem [shape: f32[8,1], index: 6, kind: input, shape index: {}]   ;;  %s488_s7 = inlined_call_operand.hbm [shape: f32[1,8], index: 7, kind: output, shape index: {}]  }
   0x1   :  { %13 = vsyncpa [#allocation4], 0  ;;  %s410_s24 = smov [#allocation2]  }
   0x2   :  { %s25_s25 = sshll.u32 %s410_s24, 4  ;;  %s26_s25 = int_to_ptr.vmem [resolvable:$true] %s25_s25 }
   0x3   :  { %s374_s26 = scalar_lea.vmem %s26_s25, 1024  ;;  %p379_p1 = scmp.lt.s32.totalorder %s26_s25, %s26_s25 }
   0x4   :  { %p375_p0 = scmp.ne.s32.totalorder %s26_s25, %s374_s26  ;;  %p380_p2 = scmp.lt.s32.totalorder %s374_s26, %s374_s26 }
   0x6   :  { %p381_p3 = por %p380_p2, %p379_p1 }
   0x8   :  { %p382_p4 = pnand %p381_p3, %p375_p0 }
   0xa   :  { %385 = shalt.err (!%p382_p4)
}
   0xb   :  { %s411_s27 = smov 64   ;;  %s412_s28 = smov 4  }
   0xc   :  { %31 = dma.hbm_to_vmem [thread:$0]  %s484_s3, 1024, %s26_s25, [#allocation3], %s411_s27, %s411_s27, %s412_s28  }
   0xd   :  { %406 = dma.done.wait [#allocation3], 1024  }
   0xe   :  { %407 = vsyncadd [#allocation3], 4294966272  ;;  %v413_v0 = vmov 0.0   ;;  %vm414_vm0 = vmmov 0   ;;  %v353_v1 = vld [vmem:[%s482_s1] sm:$0xff]   ;;  %vm58_vm1 = vcmask 130048  }
   0xf   :  { %313 = vmatprep.subr.bf16.mxu0 %v413_v0  ;;  %315 = vmatprep.mubr.msk.bf16.mxu0 %vm414_vm0, %v413_v0  ;;  %v42_v2 = vld [vmem:[%s481_s0] sm:$0xf]  ;;  %v354_v3 = vld [vmem:[#allocation2 + $0x38] sm:$0xff]   ;;  %v355_v4 = vld [vmem:[#allocation2 + $0x30] sm:$0xff]   ;;  %v415_v20 = vmov 0   ;;  %vm270_vm2 = vcmask 57344  }
  0x10   :  { %319 = vmatprep.subr.bf16.mxu1 %v413_v0  ;;  %335 = vmatprep.mubr.msk.bf16.mxu1 %vm414_vm0, %v413_v0  ;;  %v356_v5 = vld [vmem:[#allocation2 + $0x28] sm:$0xff]   ;;  %v357_v6 = vld [vmem:[#allocation2 + $0x20] sm:$0xff]   ;;  %v358_v7 = vld [vmem:[#allocation2 + $0x18] sm:$0xff]  }
  0x11   :  { %314 = vmatpush3.bf16.msra.mxu0 %v353_v1  ;;  %320 = vmatpush3.bf16.msra.mxu1 %v354_v3  ;;  %v359_v8 = vld [vmem:[#allocation2 + $0x10] sm:$0xff]   ;;  %v360_v9 = vld [vmem:[#allocation2 + $0x8] sm:$0xff]   ;;  %v361_v10 = vld [vmem:[#allocation2] sm:$0xff]  }
  0x12   :  { %339 = vmatprep.subr.bf16.mxu0 %v413_v0  ;;  %321 = vmatprep.subr.bf16.mxu1 %v413_v0  ;;  %v287_v11 = vld [vmem:[%s483_s2] ss:$0 sm:$0xff] }
  0x13   :  { %v218_v19 = vld [vmem:[%s487_s6] sm:$0xff]  ;;  %352 = vset.pattern.permute.xlu0 %v415_v20 }
  0x14   :  { %316 = vmatmul.mubr.msk.bf16.vlgmr.msra.gmra.mxu0 %vm58_vm1, %v42_v2  ;;  %221 = vperm.xlu0 %352, %v218_v19   ;;  %v290_v21 = vld [vmem:[%s485_s4] ss:$0 sm:$0xff]  ;;  %s416_s4 = smov [#allocation5]  }
  0x15   :  { %341 = vmatprep.mubr.msk.bf16.mxu0 %vm414_vm0, %v413_v0  ;;  %322 = vmatpush3.bf16.msra.mxu1 %v355_v4  ;;  %v217_v29 = vld [vmem:[%s486_s5] sm:$0xf]  ;;  %s278_s6 = sshll.u32 %s416_s4, 4  ;;  %s279_s6 = int_to_ptr.vmem [resolvable:$true] %s278_s6 }
  0x16   :  { %323 = vmatprep.subr.bf16.mxu1 %v413_v0  ;;  %s386_s16 = scalar_lea.vmem %s279_s6, 16  ;;  %s390_s5 = scalar_lea.vmem %s279_s6, 32 }
  0x17   :  { %p387_p5 = scmp.ne.s32.totalorder %s279_s6, %s386_s16  ;;  %p391_p6 = scmp.lt.s32.totalorder %s279_s6, %s279_s6 }
  0x18   :  { %p392_p7 = scmp.lt.s32.totalorder %s390_s5, %s386_s16 }
  0x19   :  { %324 = vmatpush3.bf16.msra.mxu1 %v356_v5 }
  0x1a   :  { %325 = vmatprep.subr.bf16.mxu1 %v413_v0  ;;  %p393_p8 = por %p392_p7, %p391_p6 }
  0x1c   :  { %p394_p9 = pnand %p393_p8, %p387_p5 }
  0x1d   :  { %326 = vmatpush3.bf16.msra.mxu1 %v357_v6 }
  0x1e   :  { %327 = vmatprep.subr.bf16.mxu1 %v413_v0 }
  0x21   :  { %328 = vmatpush3.bf16.msra.mxu1 %v358_v7 }
  0x22   :  { %329 = vmatprep.subr.bf16.mxu1 %v413_v0 }
  0x25   :  { %330 = vmatpush3.bf16.msra.mxu1 %v359_v8 }
  0x26   :  { %331 = vmatprep.subr.bf16.mxu1 %v413_v0 }
  0x29   :  { %332 = vmatpush3.bf16.msra.mxu1 %v360_v9 }
  0x2a   :  { %333 = vmatprep.subr.bf16.mxu1 %v413_v0 }
  0x2d   :  { %334 = vmatpush3.bf16.msra.mxu1 %v361_v10 }
  0x8f   :  { %v222_v30 = vpop.permute.xlu0 %221 }
  0xd4   :  { %v96_v12 = vpop.f32.mrf.mxu0 }
  0xd5   :  { %v97_v13 = vadd.f32 %v287_v11, %v96_v12 }
  0xd6   :  { %v317_v14 = vpop.f32.mrf.mxu0 }
  0xd7   :  { %v102_v15 = vmax.f32 %v97_v13, 0.0 }
  0xd8   :  { %v99_v16 = vpop.f32.mrf.mxu0 }
  0xd9   :  { %v103_v17 = vpack.c.bf16 %v102_v15, %v102_v15 }
  0xda   :  { %v318_v18 = vpop.f32.mrf.mxu0 }
  0xdb   :  { %336 = vmatmul.mubr.bf16.vlgmr.msra.gmra.mxu1 %v103_v17 }
 0x19b   :  { %v209_v22 = vpop.f32.mrf.mxu1 }
 0x19c   :  { %v210_v23 = vadd.f32 %v290_v21, %v209_v22 }
 0x19d   :  { %v337_v24 = vpop.f32.mrf.mxu1 }
 0x19e   :  { %v215_v25 = vmax.f32 %v210_v23, 0.0 }
 0x19f   :  { %v212_v26 = vpop.f32.mrf.mxu1 }
 0x1a0   :  { %v216_v27 = vpack.c.bf16 %v215_v25, %v215_v25 }
 0x1a1   :  { %v338_v28 = vpop.f32.mrf.mxu1 }
 0x1a2   :  { %340 = vmatpush3.bf16.xpose.msra.mxu0 %v216_v27 }
 0x1a9   :  { %342 = vmatmul.mubr.bf16.vlgmr.msra.gmra.mxu0 %v217_v29 }
 0x269   :  { %v258_v31 = vpop.f32.mrf.mxu0 }
 0x26a   :  { %v259_v32 = vadd.f32 %v258_v31, %v222_v30 }
 0x26b   :  { %v343_v33 = vpop.f32.mrf.mxu0 }
 0x26c   :  { %v299_v34 = vmul.f32 -1.442695, %v259_v32 }
 0x26d   :  { %v261_v35 = vpop.f32.mrf.mxu0 }
 0x26e   :  { %362 = vpow2.f32 %v299_v34 }
 0x26f   :  { %v344_v36 = vpop.f32.mrf.mxu0 }
 0x27b   :  { %v363_v37 = vpop.eup %362 }
 0x27c   :  { %v267_v38 = vadd.f32 1.0, %v363_v37 }
 0x27e   :  { %364 = vrcp.f32 %v267_v38 }
 0x28b   :  { %v365_v39 = vpop.eup %364 }
 0x28c   :  { %271 = vst.msk [vmem:[#allocation5] sm:$0x1] %vm270_vm2, %v365_v39 }
 0x28d   :  { %397 = shalt.err (!%p394_p9)
}
 0x28e   :  { %281 = dma.vmem_to_hbm [thread:$0]  %s279_s6, 16, %s488_s7, [#allocation4]  }
 0x28f   :  { %408 = dma.done.wait [#allocation4], 16  }
 0x290   :  { %409 = vsyncadd [#allocation4], 4294967280 }
 0x291   :  { %285 = vsyncpa [#allocation3], 1 }
 0x292   :  { %286 = vsyncpa [#allocation4], 1 }

</bundles_post_ra>
